<compile_context>
chip_gen: v7x
topology: tpu7x:2x2x1
jax: 0.10.0
libtpu: 0.0.40
codegen_flags: <defaults>
</compile_context>

<pallas_src>
import functools

import jax
import jax.numpy as jnp
from jax import lax
from jax.experimental import pallas as pl
from jax.experimental.pallas import tpu as pltpu


# ---------------------------------------------------------------------------
# Kernel 1: fused GCN (query batch + support batch in one call)
# ---------------------------------------------------------------------------

def _gcn_pair_kernel(qx_ref, qadj_ref, qinv_ref, sx_ref, sadj_ref, sinv_ref, w_ref,
                     qo_ref, so_ref):
    w = w_ref[...]
    # query batch: relu((adj @ (x @ W)) * (1/deg))
    qxw = jnp.dot(qx_ref[...], w, preferred_element_type=jnp.float32)
    qagg = jnp.dot(qadj_ref[...], qxw, preferred_element_type=jnp.float32)
    qo_ref[...] = jnp.maximum(qagg * qinv_ref[...], 0.0).astype(qo_ref.dtype)
    # support batch (W stays resident in VMEM across both)
    sxw = jnp.dot(sx_ref[...], w, preferred_element_type=jnp.float32)
    sagg = jnp.dot(sadj_ref[...], sxw, preferred_element_type=jnp.float32)
    so_ref[...] = jnp.maximum(sagg * sinv_ref[...], 0.0).astype(so_ref.dtype)


def gcn_relu_pair(q_feat, q_adj, q_inv_deg, s_feat, s_adj, s_inv_deg, w):
    nq, f = q_feat.shape
    ns = s_feat.shape[0]
    h = w.shape[1]
    return pl.pallas_call(
        _gcn_pair_kernel,
        out_shape=(jax.ShapeDtypeStruct((nq, h), jnp.float32),
                   jax.ShapeDtypeStruct((ns, h), jnp.float32)),
        grid=(1,),
        in_specs=[
            pl.BlockSpec((nq, f), lambda i: (0, 0)),
            pl.BlockSpec((nq, nq), lambda i: (0, 0)),
            pl.BlockSpec((nq, 1), lambda i: (0, 0)),
            pl.BlockSpec((ns, f), lambda i: (0, 0)),
            pl.BlockSpec((ns, ns), lambda i: (0, 0)),
            pl.BlockSpec((ns, 1), lambda i: (0, 0)),
            pl.BlockSpec((f, h), lambda i: (0, 0)),
        ],
        out_specs=(pl.BlockSpec((nq, h), lambda i: (0, 0)),
                   pl.BlockSpec((ns, h), lambda i: (0, 0))),
        compiler_params=pltpu.CompilerParams(dimension_semantics=("arbitrary",)),
    )(q_feat, q_adj, q_inv_deg, s_feat, s_adj, s_inv_deg, w)


# ---------------------------------------------------------------------------
# Kernel 2: fully-fused matching / aggregate / final, gridded over query graphs
# ---------------------------------------------------------------------------

def _matching_kernel(q_ref, s_ref, wm_ref, wt_ref, wb_ref, ab_ref, fw_ref, fb_ref,
                     o_ref, *, num_support, s_sz, num_layers):
    f32 = jnp.float32
    query_cat = q_ref[...].astype(f32)        # (q_sz, h)
    support_vec = s_ref[...].astype(f32)      # (Ns, h), Ns = num_support * s_sz
    wm = wm_ref[...]
    wt = wt_ref[...]                          # aggregate W rows [:h]   (matching half)
    wb = wb_ref[...]                          # aggregate W rows [h:]   (identity half)
    bias = ab_ref[...]                        # (1, h)
    inv_ns = 1.0 / float(num_support)

    for _ in range(num_layers):               # args.layer, unrolled at trace time
        # ---- query -> support matching, batched over ALL support nodes ------
        aw = jnp.dot(query_cat, wm, preferred_element_type=f32)            # (q, h)
        s_all = lax.dot_general(aw, support_vec, (((1,), (1,)), ((), ())),
                                preferred_element_type=f32)                # (q, Ns)
        # ---- support -> query matching (row softmax is per-node => batched) -
        bw = jnp.dot(support_vec, wm, preferred_element_type=f32)          # (Ns, h)
        t_all = lax.dot_general(bw, query_cat, (((1,), (1,)), ((), ())),
                                preferred_element_type=f32)                # (Ns, q)
        t_max = jnp.max(t_all, axis=-1, keepdims=True)
        t_exp = jnp.exp(t_all - t_max)
        t_attn = t_exp * pl.reciprocal(jnp.sum(t_exp, axis=-1, keepdims=True),
                                       approx=True)
        m_s_all = jnp.dot(t_attn, query_cat, preferred_element_type=f32)   # (Ns, h)

        # per-support-graph softmax over support nodes; accumulate mean term
        m_q_sum = jnp.zeros_like(query_cat)
        for sg in range(num_support):
            blk = s_all[:, sg * s_sz:(sg + 1) * s_sz]                      # (q, s_sz)
            b_max = jnp.max(blk, axis=-1, keepdims=True)
            b_exp = jnp.exp(blk - b_max)
            attn = b_exp * pl.reciprocal(jnp.sum(b_exp, axis=-1, keepdims=True),
                                         approx=True)
            supp = support_vec[sg * s_sz:(sg + 1) * s_sz, :]               # (s_sz, h)
            m_q_sum = m_q_sum + jnp.dot(attn, supp, preferred_element_type=f32)

        # aggregate Linear without concat: [m, x] @ W == m @ W_top + x @ W_bot
        support_vec = (jnp.dot(m_s_all, wt, preferred_element_type=f32)
                       + jnp.dot(support_vec, wb, preferred_element_type=f32)
                       + bias)
        layer_match = jnp.maximum(m_q_sum * inv_ns, 0.0)
        query_cat = (jnp.dot(layer_match, wt, preferred_element_type=f32)
                     + jnp.dot(query_cat, wb, preferred_element_type=f32)
                     + bias)

    # final Linear + row-mean folded in: mean_rows(x @ w + b) == mean_rows(x) @ w + b
    q_mean = jnp.mean(query_cat, axis=0, keepdims=True)                    # (1, h)
    score = jnp.sum(q_mean * fw_ref[...], axis=-1, keepdims=True) + fb_ref[...]
    o_ref[0, :, :] = score.astype(o_ref.dtype)                             # (1, 1)


def fused_matching(query_x, support_x, match_w, agg_wt, agg_wb, agg_b, fin_w, fin_b,
                   *, num_query, q_sz, num_support, s_sz, num_layers):
    h = query_x.shape[1]
    ns = support_x.shape[0]
    kernel = functools.partial(_matching_kernel, num_support=num_support,
                               s_sz=s_sz, num_layers=num_layers)
    return pl.pallas_call(
        kernel,
        out_shape=jax.ShapeDtypeStruct((num_query, 1, 1), jnp.float32),
        grid=(num_query,),
        in_specs=[
            pl.BlockSpec((q_sz, h), lambda qg: (qg, 0)),   # per-query-graph block
            pl.BlockSpec((ns, h), lambda qg: (0, 0)),      # support set (resident)
            pl.BlockSpec((h, h), lambda qg: (0, 0)),       # match W
            pl.BlockSpec((h, h), lambda qg: (0, 0)),       # aggregate W (top rows)
            pl.BlockSpec((h, h), lambda qg: (0, 0)),       # aggregate W (bottom rows)
            pl.BlockSpec((1, h), lambda qg: (0, 0)),       # aggregate bias
            pl.BlockSpec((1, h), lambda qg: (0, 0)),       # final W (row vector)
            pl.BlockSpec((1, 1), lambda qg: (0, 0)),       # final bias
        ],
        out_specs=pl.BlockSpec((1, 1, 1), lambda qg: (qg, 0, 0)),
        compiler_params=pltpu.CompilerParams(dimension_semantics=("parallel",)),
    )(query_x, support_x, match_w, agg_wt, agg_wb, agg_b, fin_w, fin_b)


# ---------------------------------------------------------------------------
# GraphMatching forward
# ---------------------------------------------------------------------------

class Args:
    layer = 2


@functools.partial(jax.jit,
                   static_argnames=("num_query", "q_sz", "num_support", "s_sz",
                                    "num_layers"))
def _forward(gc1_w, match_w, agg_w, agg_b, fin_w, fin_b,
             q_feat, q_adj, q_deg, s_feat, s_adj, s_deg, *,
             num_query, q_sz, num_support, s_sz, num_layers):
    q_inv = 1.0 / q_deg                       # precomputed reciprocal (one-time)
    s_inv = 1.0 / s_deg
    query_x, support_x = gcn_relu_pair(q_feat, q_adj, q_inv,
                                       s_feat, s_adj, s_inv, gc1_w)
    h = gc1_w.shape[1]
    agg_wt, agg_wb = agg_w[:h], agg_w[h:]     # split once: concat -> two matmuls
    bias = agg_b.reshape(1, h)
    scores = fused_matching(query_x, support_x, match_w, agg_wt, agg_wb, bias,
                            fin_w, fin_b,
                            num_query=num_query, q_sz=q_sz,
                            num_support=num_support, s_sz=s_sz,
                            num_layers=num_layers)
    return scores.reshape(num_query, 1)


def graph_matching_forward(params, args,
                           query_feat, query_adj, query_deg, query_sizes,
                           support_feat, support_adj, support_deg, support_sizes,
                           final_id):
    q_sz = int(query_sizes[0])
    s_sz = int(support_sizes[0])
    # The fused/batched kernel path requires uniform graph sizes (as generated).
    assert all(int(s) == q_sz for s in query_sizes)
    assert all(int(s) == s_sz for s in support_sizes)
    h = params["gc1_w"].shape[1]
    fin_w = params["final_w"][final_id].reshape(1, h)   # (h,1) -> (1,h) row vector
    fin_b = params["final_b"][final_id].reshape(1, 1)
    return _forward(params["gc1_w"], params["match_w"], params["agg_w"],
                    params["agg_b"], fin_w, fin_b,
                    query_feat, query_adj, query_deg,
                    support_feat, support_adj, support_deg,
                    num_query=len(query_sizes), q_sz=q_sz,
                    num_support=len(support_sizes), s_sz=s_sz,
                    num_layers=args.layer)


# ---------------------------------------------------------------------------
# Synthetic data / parameter construction
# ---------------------------------------------------------------------------

def make_batch(key, num_graphs, graph_size, nfeat):
    """Dense stand-in for process_sparse: block-diagonal adjacency with self
    loops, node features, row-sum degrees."""
    n = num_graphs * graph_size
    kf, ka = jax.random.split(key)
    feat = jax.random.normal(kf, (n, nfeat), dtype=jnp.float32)
    adj = jnp.zeros((n, n), dtype=jnp.float32)
    for g in range(num_graphs):
        ka, kg = jax.random.split(ka)
        blk = (jax.random.uniform(kg, (graph_size, graph_size)) > 0.5).astype(jnp.float32)
        blk = jnp.maximum(blk, blk.T)
        blk = blk.at[jnp.arange(graph_size), jnp.arange(graph_size)].set(1.0)
        adj = adj.at[g * graph_size:(g + 1) * graph_size,
                     g * graph_size:(g + 1) * graph_size].set(blk)
    deg = jnp.maximum(jnp.sum(adj, axis=1, keepdims=True), 1.0)
    sizes = [graph_size] * num_graphs
    return feat, adj, deg, sizes


def make_params(key, nfeat, nhid, nclass):
    ks = jax.random.split(key, 8)
    scale = 0.1
    return {
        "gc1_w": scale * jax.random.normal(ks[0], (nfeat, nhid), jnp.float32),
        "match_w": scale * jax.random.normal(ks[1], (nhid, nhid), jnp.float32),
        "agg_w": scale * jax.random.normal(ks[2], (2 * nhid, nhid), jnp.float32),
        "agg_b": scale * jax.random.normal(ks[3], (nhid,), jnp.float32),
        "final_w": [scale * jax.random.normal(ks[4], (nhid, 1), jnp.float32),
                    scale * jax.random.normal(ks[5], (nhid, 1), jnp.float32)],
        "final_b": [scale * jax.random.normal(ks[6], (1,), jnp.float32),
                    scale * jax.random.normal(ks[7], (1,), jnp.float32)],
        # self.message (GraphConvolution(2*nhid, nhid)) is unused in forward.
    }


if __name__ == "__main__":
    nfeat, nhid, nclass = 16, 32, 2
    graph_size = 8
    num_query_graphs, num_support_graphs = 2, 2
    args = Args()

    root = jax.random.PRNGKey(0)
    kp, kq, ks = jax.random.split(root, 3)
    params = make_params(kp, nfeat, nhid, nclass)

    q_feat, q_adj, q_deg, q_sizes = make_batch(kq, num_query_graphs, graph_size, nfeat)
    s_feat, s_adj, s_deg, s_sizes = make_batch(ks, num_support_graphs, graph_size, nfeat)

    out = graph_matching_forward(
        params, args,
        q_feat, q_adj, q_deg, q_sizes,
        s_feat, s_adj, s_deg, s_sizes,
        final_id=0)
    out = jax.block_until_ready(out)
    assert out.shape == (num_query_graphs, 1)
    print("KERNEL_OK")
</pallas_src>

<mosaic_0001>
module attributes {stable_mosaic.version = 11 : i64} {
  func.func @_gcn_pair_kernel(%arg0: i32, %arg1: memref<16x16xf32, #tpu.memory_space<vmem>>, %arg2: memref<16x16xf32, #tpu.memory_space<vmem>>, %arg3: memref<16x1xf32, #tpu.memory_space<vmem>>, %arg4: memref<16x16xf32, #tpu.memory_space<vmem>>, %arg5: memref<16x16xf32, #tpu.memory_space<vmem>>, %arg6: memref<16x1xf32, #tpu.memory_space<vmem>>, %arg7: memref<16x32xf32, #tpu.memory_space<vmem>>, %arg8: memref<16x32xf32, #tpu.memory_space<vmem>>, %arg9: memref<16x32xf32, #tpu.memory_space<vmem>>) attributes {dimension_semantics = [#tpu.dimension_semantics<arbitrary>], iteration_bounds = array<i64: 1>, scalar_prefetch = 0 : i64, scratch_operands = 0 : i64, tpu.core_type = #tpu.core_type<tc>, window_params = [{pipeline_mode = #tpu.pipeline_mode<synchronous>, transform_indices = @transform_0, window_bounds = array<i64: 16, 16>}, {pipeline_mode = #tpu.pipeline_mode<synchronous>, transform_indices = @transform_1, window_bounds = array<i64: 16, 16>}, {pipeline_mode = #tpu.pipeline_mode<synchronous>, transform_indices = @transform_2, window_bounds = array<i64: 16, 1>}, {pipeline_mode = #tpu.pipeline_mode<synchronous>, transform_indices = @transform_3, window_bounds = array<i64: 16, 16>}, {pipeline_mode = #tpu.pipeline_mode<synchronous>, transform_indices = @transform_4, window_bounds = array<i64: 16, 16>}, {pipeline_mode = #tpu.pipeline_mode<synchronous>, transform_indices = @transform_5, window_bounds = array<i64: 16, 1>}, {pipeline_mode = #tpu.pipeline_mode<synchronous>, transform_indices = @transform_6, window_bounds = array<i64: 16, 32>}, {pipeline_mode = #tpu.pipeline_mode<synchronous>, transform_indices = @transform_7, window_bounds = array<i64: 16, 32>}, {pipeline_mode = #tpu.pipeline_mode<synchronous>, transform_indices = @transform_8, window_bounds = array<i64: 16, 32>}]} {
    %c0 = arith.constant 0 : index
    %c0_0 = arith.constant 0 : index
    %0 = vector.load %arg7[%c0, %c0_0] : memref<16x32xf32, #tpu.memory_space<vmem>>, vector<16x32xf32>
    %c0_1 = arith.constant 0 : index
    %c0_2 = arith.constant 0 : index
    %1 = vector.load %arg1[%c0_1, %c0_2] : memref<16x16xf32, #tpu.memory_space<vmem>>, vector<16x16xf32>
    %cst = arith.constant dense<0.000000e+00> : vector<16x32xf32>
    %2 = tpu.matmul %1, %0, %cst {dimension_numbers = #tpu.dot_dimension_numbers<[1], [0], [0], [1], [0, 0, 1, 1], [], []>} : vector<16x16xf32>, vector<16x32xf32>, vector<16x32xf32> -> vector<16x32xf32>
    %c0_3 = arith.constant 0 : index
    %c0_4 = arith.constant 0 : index
    %3 = vector.load %arg2[%c0_3, %c0_4] : memref<16x16xf32, #tpu.memory_space<vmem>>, vector<16x16xf32>
    %cst_5 = arith.constant dense<0.000000e+00> : vector<16x32xf32>
    %4 = tpu.matmul %3, %2, %cst_5 {dimension_numbers = #tpu.dot_dimension_numbers<[1], [0], [0], [1], [0, 0, 1, 1], [], []>} : vector<16x16xf32>, vector<16x32xf32>, vector<16x32xf32> -> vector<16x32xf32>
    %c0_6 = arith.constant 0 : index
    %c0_7 = arith.constant 0 : index
    %5 = vector.load %arg3[%c0_6, %c0_7] : memref<16x1xf32, #tpu.memory_space<vmem>>, vector<16x1xf32>
    %6 = vector.broadcast %5 : vector<16x1xf32> to vector<16x32xf32>
    %7 = arith.mulf %4, %6 : vector<16x32xf32>
    %cst_8 = arith.constant 0.000000e+00 : f32
    %8 = vector.broadcast %cst_8 : f32 to vector<16x32xf32>
    %9 = arith.maximumf %7, %8 : vector<16x32xf32>
    %c0_9 = arith.constant 0 : index
    %c0_10 = arith.constant 0 : index
    %10 = vector.load %arg8[%c0_9, %c0_10] : memref<16x32xf32, #tpu.memory_space<vmem>>, vector<16x32xf32>
    tpu.vector_store %arg8[%c0_9, %c0_10], %9 {strides = array<i32>} : memref<16x32xf32, #tpu.memory_space<vmem>>, vector<16x32xf32>,
    %c0_11 = arith.constant 0 : index
    %c0_12 = arith.constant 0 : index
    %11 = vector.load %arg4[%c0_11, %c0_12] : memref<16x16xf32, #tpu.memory_space<vmem>>, vector<16x16xf32>
    %cst_13 = arith.constant dense<0.000000e+00> : vector<16x32xf32>
    %12 = tpu.matmul %11, %0, %cst_13 {dimension_numbers = #tpu.dot_dimension_numbers<[1], [0], [0], [1], [0, 0, 1, 1], [], []>} : vector<16x16xf32>, vector<16x32xf32>, vector<16x32xf32> -> vector<16x32xf32>
    %c0_14 = arith.constant 0 : index
    %c0_15 = arith.constant 0 : index
    %13 = vector.load %arg5[%c0_14, %c0_15] : memref<16x16xf32, #tpu.memory_space<vmem>>, vector<16x16xf32>
    %cst_16 = arith.constant dense<0.000000e+00> : vector<16x32xf32>
    %14 = tpu.matmul %13, %12, %cst_16 {dimension_numbers = #tpu.dot_dimension_numbers<[1], [0], [0], [1], [0, 0, 1, 1], [], []>} : vector<16x16xf32>, vector<16x32xf32>, vector<16x32xf32> -> vector<16x32xf32>
    %c0_17 = arith.constant 0 : index
    %c0_18 = arith.constant 0 : index
    %15 = vector.load %arg6[%c0_17, %c0_18] : memref<16x1xf32, #tpu.memory_space<vmem>>, vector<16x1xf32>
    %16 = vector.broadcast %15 : vector<16x1xf32> to vector<16x32xf32>
    %17 = arith.mulf %14, %16 : vector<16x32xf32>
    %cst_19 = arith.constant 0.000000e+00 : f32
    %18 = vector.broadcast %cst_19 : f32 to vector<16x32xf32>
    %19 = arith.maximumf %17, %18 : vector<16x32xf32>
    %c0_20 = arith.constant 0 : index
    %c0_21 = arith.constant 0 : index
    %20 = vector.load %arg9[%c0_20, %c0_21] : memref<16x32xf32, #tpu.memory_space<vmem>>, vector<16x32xf32>
    tpu.vector_store %arg9[%c0_20, %c0_21], %19 {strides = array<i32>} : memref<16x32xf32, #tpu.memory_space<vmem>>, vector<16x32xf32>,
    return
  }
  func.func @transform_0(%arg0: i32) -> (i32, i32) {
    %c0_i32 = arith.constant 0 : i32
    %c0_i32_0 = arith.constant 0 : i32
    %c0_i32_1 = arith.constant 0 : i32
    return %c0_i32, %c0_i32_0 : i32, i32
  }
  func.func @transform_1(%arg0: i32) -> (i32, i32) {
    %c0_i32 = arith.constant 0 : i32
    %c0_i32_0 = arith.constant 0 : i32
    %c0_i32_1 = arith.constant 0 : i32
    return %c0_i32, %c0_i32_0 : i32, i32
  }
  func.func @transform_2(%arg0: i32) -> (i32, i32) {
    %c0_i32 = arith.constant 0 : i32
    %c0_i32_0 = arith.constant 0 : i32
    %c0_i32_1 = arith.constant 0 : i32
    return %c0_i32, %c0_i32_0 : i32, i32
  }
  func.func @transform_3(%arg0: i32) -> (i32, i32) {
    %c0_i32 = arith.constant 0 : i32
    %c0_i32_0 = arith.constant 0 : i32
    %c0_i32_1 = arith.constant 0 : i32
    return %c0_i32, %c0_i32_0 : i32, i32
  }
  func.func @transform_4(%arg0: i32) -> (i32, i32) {
    %c0_i32 = arith.constant 0 : i32
    %c0_i32_0 = arith.constant 0 : i32
    %c0_i32_1 = arith.constant 0 : i32
    return %c0_i32, %c0_i32_0 : i32, i32
  }
  func.func @transform_5(%arg0: i32) -> (i32, i32) {
    %c0_i32 = arith.constant 0 : i32
    %c0_i32_0 = arith.constant 0 : i32
    %c0_i32_1 = arith.constant 0 : i32
    return %c0_i32, %c0_i32_0 : i32, i32
  }
  func.func @transform_6(%arg0: i32) -> (i32, i32) {
    %c0_i32 = arith.constant 0 : i32
    %c0_i32_0 = arith.constant 0 : i32
    %c0_i32_1 = arith.constant 0 : i32
    return %c0_i32, %c0_i32_0 : i32, i32
  }
  func.func @transform_7(%arg0: i32) -> (i32, i32) {
    %c0_i32 = arith.constant 0 : i32
    %c0_i32_0 = arith.constant 0 : i32
    %c0_i32_1 = arith.constant 0 : i32
    return %c0_i32, %c0_i32_0 : i32, i32
  }
  func.func @transform_8(%arg0: i32) -> (i32, i32) {
    %c0_i32 = arith.constant 0 : i32
    %c0_i32_0 = arith.constant 0 : i32
    %c0_i32_1 = arith.constant 0 : i32
    return %c0_i32, %c0_i32_0 : i32, i32
  }
}

module attributes {stable_mosaic.version = 11 : i64} {
  func.func @_matching_kernel(%arg0: i32, %arg1: memref<8x32xf32, #tpu.memory_space<vmem>>, %arg2: memref<16x32xf32, #tpu.memory_space<vmem>>, %arg3: memref<32x32xf32, #tpu.memory_space<vmem>>, %arg4: memref<32x32xf32, #tpu.memory_space<vmem>>, %arg5: memref<32x32xf32, #tpu.memory_space<vmem>>, %arg6: memref<1x32xf32, #tpu.memory_space<vmem>>, %arg7: memref<1x32xf32, #tpu.memory_space<vmem>>, %arg8: memref<1x1xf32, #tpu.memory_space<vmem>>, %arg9: memref<1x1x1xf32, #tpu.memory_space<vmem>>) attributes {dimension_semantics = [#tpu.dimension_semantics<parallel>], iteration_bounds = array<i64: 2>, scalar_prefetch = 0 : i64, scratch_operands = 0 : i64, tpu.core_type = #tpu.core_type<tc>, window_params = [{transform_indices = @transform_0, window_bounds = array<i64: 8, 32>}, {pipeline_mode = #tpu.pipeline_mode<synchronous>, transform_indices = @transform_1, window_bounds = array<i64: 16, 32>}, {pipeline_mode = #tpu.pipeline_mode<synchronous>, transform_indices = @transform_2, window_bounds = array<i64: 32, 32>}, {pipeline_mode = #tpu.pipeline_mode<synchronous>, transform_indices = @transform_3, window_bounds = array<i64: 32, 32>}, {pipeline_mode = #tpu.pipeline_mode<synchronous>, transform_indices = @transform_4, window_bounds = array<i64: 32, 32>}, {pipeline_mode = #tpu.pipeline_mode<synchronous>, transform_indices = @transform_5, window_bounds = array<i64: 1, 32>}, {pipeline_mode = #tpu.pipeline_mode<synchronous>, transform_indices = @transform_6, window_bounds = array<i64: 1, 32>}, {pipeline_mode = #tpu.pipeline_mode<synchronous>, transform_indices = @transform_7, window_bounds = array<i64: 1, 1>}, {transform_indices = @transform_8, window_bounds = array<i64: 1, 1, 1>}]} {
    %c0 = arith.constant 0 : index
    %c0_0 = arith.constant 0 : index
    %0 = vector.load %arg1[%c0, %c0_0] : memref<8x32xf32, #tpu.memory_space<vmem>>, vector<8x32xf32>
    %c0_1 = arith.constant 0 : index
    %c0_2 = arith.constant 0 : index
    %1 = vector.load %arg2[%c0_1, %c0_2] : memref<16x32xf32, #tpu.memory_space<vmem>>, vector<16x32xf32>
    %c0_3 = arith.constant 0 : index
    %c0_4 = arith.constant 0 : index
    %2 = vector.load %arg3[%c0_3, %c0_4] : memref<32x32xf32, #tpu.memory_space<vmem>>, vector<32x32xf32>
    %c0_5 = arith.constant 0 : index
    %c0_6 = arith.constant 0 : index
    %3 = vector.load %arg4[%c0_5, %c0_6] : memref<32x32xf32, #tpu.memory_space<vmem>>, vector<32x32xf32>
    %c0_7 = arith.constant 0 : index
    %c0_8 = arith.constant 0 : index
    %4 = vector.load %arg5[%c0_7, %c0_8] : memref<32x32xf32, #tpu.memory_space<vmem>>, vector<32x32xf32>
    %c0_9 = arith.constant 0 : index
    %c0_10 = arith.constant 0 : index
    %5 = vector.load %arg6[%c0_9, %c0_10] : memref<1x32xf32, #tpu.memory_space<vmem>>, vector<1x32xf32>
    %cst = arith.constant dense<0.000000e+00> : vector<8x32xf32>
    %6 = tpu.matmul %0, %2, %cst {dimension_numbers = #tpu.dot_dimension_numbers<[1], [0], [0], [1], [0, 0, 1, 1], [], []>} : vector<8x32xf32>, vector<32x32xf32>, vector<8x32xf32> -> vector<8x32xf32>
    %cst_11 = arith.constant dense<0.000000e+00> : vector<8x16xf32>
    %7 = tpu.matmul %6, %1, %cst_11 {dimension_numbers = #tpu.dot_dimension_numbers<[1], [1], [0], [0], [0, 0, 1, 0], [], []>} : vector<8x32xf32>, vector<16x32xf32>, vector<8x16xf32> -> vector<8x16xf32>
    %cst_12 = arith.constant dense<0.000000e+00> : vector<16x32xf32>
    %8 = tpu.matmul %1, %2, %cst_12 {dimension_numbers = #tpu.dot_dimension_numbers<[1], [0], [0], [1], [0, 0, 1, 1], [], []>} : vector<16x32xf32>, vector<32x32xf32>, vector<16x32xf32> -> vector<16x32xf32>
    %cst_13 = arith.constant dense<0.000000e+00> : vector<16x8xf32>
    %9 = tpu.matmul %8, %0, %cst_13 {dimension_numbers = #tpu.dot_dimension_numbers<[1], [1], [0], [0], [0, 0, 1, 0], [], []>} : vector<16x32xf32>, vector<8x32xf32>, vector<16x8xf32> -> vector<16x8xf32>
    %cst_14 = arith.constant dense<0xFF800000> : vector<16xf32>
    %10 = vector.multi_reduction <maximumf>, %9, %cst_14 [1] : vector<16x8xf32> to vector<16xf32>
    %11 = vector.shape_cast %10 : vector<16xf32> to vector<16x1xf32>
    %12 = vector.broadcast %11 : vector<16x1xf32> to vector<16x8xf32>
    %13 = arith.subf %9, %12 : vector<16x8xf32>
    %14 = math.exp %13 : vector<16x8xf32>
    %cst_15 = arith.constant dense<0.000000e+00> : vector<16xf32>
    %15 = vector.multi_reduction <add>, %14, %cst_15 [1] : vector<16x8xf32> to vector<16xf32>
    %16 = vector.shape_cast %15 : vector<16xf32> to vector<16x1xf32>
    %17 = tpu.reciprocal %16 {approx = true} : vector<16x1xf32> -> vector<16x1xf32>
    %18 = vector.broadcast %17 : vector<16x1xf32> to vector<16x8xf32>
    %19 = arith.mulf %14, %18 : vector<16x8xf32>
    %cst_16 = arith.constant dense<0.000000e+00> : vector<16x32xf32>
    %20 = tpu.matmul %19, %0, %cst_16 {dimension_numbers = #tpu.dot_dimension_numbers<[1], [0], [0], [1], [0, 0, 1, 1], [], []>} : vector<16x8xf32>, vector<8x32xf32>, vector<16x32xf32> -> vector<16x32xf32>
    %cst_17 = arith.constant 0.000000e+00 : f32
    %21 = vector.broadcast %cst_17 : f32 to vector<8x32xf32>
    %22 = vector.extract_strided_slice %7 {offsets = [0, 0], sizes = [8, 8], strides = [1, 1]} : vector<8x16xf32> to vector<8x8xf32>
    %cst_18 = arith.constant dense<0xFF800000> : vector<8xf32>
    %23 = vector.multi_reduction <maximumf>, %22, %cst_18 [1] : vector<8x8xf32> to vector<8xf32>
    %24 = vector.shape_cast %23 : vector<8xf32> to vector<8x1xf32>
    %25 = vector.broadcast %24 : vector<8x1xf32> to vector<8x8xf32>
    %26 = arith.subf %22, %25 : vector<8x8xf32>
    %27 = math.exp %26 : vector<8x8xf32>
    %cst_19 = arith.constant dense<0.000000e+00> : vector<8xf32>
    %28 = vector.multi_reduction <add>, %27, %cst_19 [1] : vector<8x8xf32> to vector<8xf32>
    %29 = vector.shape_cast %28 : vector<8xf32> to vector<8x1xf32>
    %30 = tpu.reciprocal %29 {approx = true} : vector<8x1xf32> -> vector<8x1xf32>
    %31 = vector.broadcast %30 : vector<8x1xf32> to vector<8x8xf32>
    %32 = arith.mulf %27, %31 : vector<8x8xf32>
    %33 = vector.extract_strided_slice %1 {offsets = [0, 0], sizes = [8, 32], strides = [1, 1]} : vector<16x32xf32> to vector<8x32xf32>
    %cst_20 = arith.constant dense<0.000000e+00> : vector<8x32xf32>
    %34 = tpu.matmul %32, %33, %cst_20 {dimension_numbers = #tpu.dot_dimension_numbers<[1], [0], [0], [1], [0, 0, 1, 1], [], []>} : vector<8x8xf32>, vector<8x32xf32>, vector<8x32xf32> -> vector<8x32xf32>
    %35 = arith.addf %21, %34 : vector<8x32xf32>
    %36 = vector.extract_strided_slice %7 {offsets = [0, 8], sizes = [8, 8], strides = [1, 1]} : vector<8x16xf32> to vector<8x8xf32>
    %cst_21 = arith.constant dense<0xFF800000> : vector<8xf32>
    %37 = vector.multi_reduction <maximumf>, %36, %cst_21 [1] : vector<8x8xf32> to vector<8xf32>
    %38 = vector.shape_cast %37 : vector<8xf32> to vector<8x1xf32>
    %39 = vector.broadcast %38 : vector<8x1xf32> to vector<8x8xf32>
    %40 = arith.subf %36, %39 : vector<8x8xf32>
    %41 = math.exp %40 : vector<8x8xf32>
    %cst_22 = arith.constant dense<0.000000e+00> : vector<8xf32>
    %42 = vector.multi_reduction <add>, %41, %cst_22 [1] : vector<8x8xf32> to vector<8xf32>
    %43 = vector.shape_cast %42 : vector<8xf32> to vector<8x1xf32>
    %44 = tpu.reciprocal %43 {approx = true} : vector<8x1xf32> -> vector<8x1xf32>
    %45 = vector.broadcast %44 : vector<8x1xf32> to vector<8x8xf32>
    %46 = arith.mulf %41, %45 : vector<8x8xf32>
    %47 = vector.extract_strided_slice %1 {offsets = [8, 0], sizes = [8, 32], strides = [1, 1]} : vector<16x32xf32> to vector<8x32xf32>
    %cst_23 = arith.constant dense<0.000000e+00> : vector<8x32xf32>
    %48 = tpu.matmul %46, %47, %cst_23 {dimension_numbers = #tpu.dot_dimension_numbers<[1], [0], [0], [1], [0, 0, 1, 1], [], []>} : vector<8x8xf32>, vector<8x32xf32>, vector<8x32xf32> -> vector<8x32xf32>
    %49 = arith.addf %35, %48 : vector<8x32xf32>
    %cst_24 = arith.constant dense<0.000000e+00> : vector<16x32xf32>
    %50 = tpu.matmul %20, %3, %cst_24 {dimension_numbers = #tpu.dot_dimension_numbers<[1], [0], [0], [1], [0, 0, 1, 1], [], []>} : vector<16x32xf32>, vector<32x32xf32>, vector<16x32xf32> -> vector<16x32xf32>
    %cst_25 = arith.constant dense<0.000000e+00> : vector<16x32xf32>
    %51 = tpu.matmul %1, %4, %cst_25 {dimension_numbers = #tpu.dot_dimension_numbers<[1], [0], [0], [1], [0, 0, 1, 1], [], []>} : vector<16x32xf32>, vector<32x32xf32>, vector<16x32xf32> -> vector<16x32xf32>
    %52 = arith.addf %50, %51 : vector<16x32xf32>
    %53 = vector.broadcast %5 : vector<1x32xf32> to vector<16x32xf32>
    %54 = arith.addf %52, %53 : vector<16x32xf32>
    %cst_26 = arith.constant 5.000000e-01 : f32
    %55 = vector.broadcast %cst_26 : f32 to vector<8x32xf32>
    %56 = arith.mulf %49, %55 : vector<8x32xf32>
    %cst_27 = arith.constant 0.000000e+00 : f32
    %57 = vector.broadcast %cst_27 : f32 to vector<8x32xf32>
    %58 = arith.maximumf %56, %57 : vector<8x32xf32>
    %cst_28 = arith.constant dense<0.000000e+00> : vector<8x32xf32>
    %59 = tpu.matmul %58, %3, %cst_28 {dimension_numbers = #tpu.dot_dimension_numbers<[1], [0], [0], [1], [0, 0, 1, 1], [], []>} : vector<8x32xf32>, vector<32x32xf32>, vector<8x32xf32> -> vector<8x32xf32>
    %cst_29 = arith.constant dense<0.000000e+00> : vector<8x32xf32>
    %60 = tpu.matmul %0, %4, %cst_29 {dimension_numbers = #tpu.dot_dimension_numbers<[1], [0], [0], [1], [0, 0, 1, 1], [], []>} : vector<8x32xf32>, vector<32x32xf32>, vector<8x32xf32> -> vector<8x32xf32>
    %61 = arith.addf %59, %60 : vector<8x32xf32>
    %62 = vector.broadcast %5 : vector<1x32xf32> to vector<8x32xf32>
    %63 = arith.addf %61, %62 : vector<8x32xf32>
    %cst_30 = arith.constant dense<0.000000e+00> : vector<8x32xf32>
    %64 = tpu.matmul %63, %2, %cst_30 {dimension_numbers = #tpu.dot_dimension_numbers<[1], [0], [0], [1], [0, 0, 1, 1], [], []>} : vector<8x32xf32>, vector<32x32xf32>, vector<8x32xf32> -> vector<8x32xf32>
    %cst_31 = arith.constant dense<0.000000e+00> : vector<8x16xf32>
    %65 = tpu.matmul %64, %54, %cst_31 {dimension_numbers = #tpu.dot_dimension_numbers<[1], [1], [0], [0], [0, 0, 1, 0], [], []>} : vector<8x32xf32>, vector<16x32xf32>, vector<8x16xf32> -> vector<8x16xf32>
    %cst_32 = arith.constant 0.000000e+00 : f32
    %66 = vector.broadcast %cst_32 : f32 to vector<8x32xf32>
    %67 = vector.extract_strided_slice %65 {offsets = [0, 0], sizes = [8, 8], strides = [1, 1]} : vector<8x16xf32> to vector<8x8xf32>
    %cst_33 = arith.constant dense<0xFF800000> : vector<8xf32>
    %68 = vector.multi_reduction <maximumf>, %67, %cst_33 [1] : vector<8x8xf32> to vector<8xf32>
    %69 = vector.shape_cast %68 : vector<8xf32> to vector<8x1xf32>
    %70 = vector.broadcast %69 : vector<8x1xf32> to vector<8x8xf32>
    %71 = arith.subf %67, %70 : vector<8x8xf32>
    %72 = math.exp %71 : vector<8x8xf32>
    %cst_34 = arith.constant dense<0.000000e+00> : vector<8xf32>
    %73 = vector.multi_reduction <add>, %72, %cst_34 [1] : vector<8x8xf32> to vector<8xf32>
    %74 = vector.shape_cast %73 : vector<8xf32> to vector<8x1xf32>
    %75 = tpu.reciprocal %74 {approx = true} : vector<8x1xf32> -> vector<8x1xf32>
    %76 = vector.broadcast %75 : vector<8x1xf32> to vector<8x8xf32>
    %77 = arith.mulf %72, %76 : vector<8x8xf32>
    %78 = vector.extract_strided_slice %54 {offsets = [0, 0], sizes = [8, 32], strides = [1, 1]} : vector<16x32xf32> to vector<8x32xf32>
    %cst_35 = arith.constant dense<0.000000e+00> : vector<8x32xf32>
    %79 = tpu.matmul %77, %78, %cst_35 {dimension_numbers = #tpu.dot_dimension_numbers<[1], [0], [0], [1], [0, 0, 1, 1], [], []>} : vector<8x8xf32>, vector<8x32xf32>, vector<8x32xf32> -> vector<8x32xf32>
    %80 = arith.addf %66, %79 : vector<8x32xf32>
    %81 = vector.extract_strided_slice %65 {offsets = [0, 8], sizes = [8, 8], strides = [1, 1]} : vector<8x16xf32> to vector<8x8xf32>
    %cst_36 = arith.constant dense<0xFF800000> : vector<8xf32>
    %82 = vector.multi_reduction <maximumf>, %81, %cst_36 [1] : vector<8x8xf32> to vector<8xf32>
    %83 = vector.shape_cast %82 : vector<8xf32> to vector<8x1xf32>
    %84 = vector.broadcast %83 : vector<8x1xf32> to vector<8x8xf32>
    %85 = arith.subf %81, %84 : vector<8x8xf32>
    %86 = math.exp %85 : vector<8x8xf32>
    %cst_37 = arith.constant dense<0.000000e+00> : vector<8xf32>
    %87 = vector.multi_reduction <add>, %86, %cst_37 [1] : vector<8x8xf32> to vector<8xf32>
    %88 = vector.shape_cast %87 : vector<8xf32> to vector<8x1xf32>
    %89 = tpu.reciprocal %88 {approx = true} : vector<8x1xf32> -> vector<8x1xf32>
    %90 = vector.broadcast %89 : vector<8x1xf32> to vector<8x8xf32>
    %91 = arith.mulf %86, %90 : vector<8x8xf32>
    %92 = vector.extract_strided_slice %54 {offsets = [8, 0], sizes = [8, 32], strides = [1, 1]} : vector<16x32xf32> to vector<8x32xf32>
    %cst_38 = arith.constant dense<0.000000e+00> : vector<8x32xf32>
    %93 = tpu.matmul %91, %92, %cst_38 {dimension_numbers = #tpu.dot_dimension_numbers<[1], [0], [0], [1], [0, 0, 1, 1], [], []>} : vector<8x8xf32>, vector<8x32xf32>, vector<8x32xf32> -> vector<8x32xf32>
    %94 = arith.addf %80, %93 : vector<8x32xf32>
    %cst_39 = arith.constant 5.000000e-01 : f32
    %95 = vector.broadcast %cst_39 : f32 to vector<8x32xf32>
    %96 = arith.mulf %94, %95 : vector<8x32xf32>
    %cst_40 = arith.constant 0.000000e+00 : f32
    %97 = vector.broadcast %cst_40 : f32 to vector<8x32xf32>
    %98 = arith.maximumf %96, %97 : vector<8x32xf32>
    %cst_41 = arith.constant dense<0.000000e+00> : vector<8x32xf32>
    %99 = tpu.matmul %98, %3, %cst_41 {dimension_numbers = #tpu.dot_dimension_numbers<[1], [0], [0], [1], [0, 0, 1, 1], [], []>} : vector<8x32xf32>, vector<32x32xf32>, vector<8x32xf32> -> vector<8x32xf32>
    %cst_42 = arith.constant dense<0.000000e+00> : vector<8x32xf32>
    %100 = tpu.matmul %63, %4, %cst_42 {dimension_numbers = #tpu.dot_dimension_numbers<[1], [0], [0], [1], [0, 0, 1, 1], [], []>} : vector<8x32xf32>, vector<32x32xf32>, vector<8x32xf32> -> vector<8x32xf32>
    %101 = arith.addf %99, %100 : vector<8x32xf32>
    %102 = vector.broadcast %5 : vector<1x32xf32> to vector<8x32xf32>
    %103 = arith.addf %101, %102 : vector<8x32xf32>
    %cst_43 = arith.constant dense<0.000000e+00> : vector<32xf32>
    %104 = vector.multi_reduction <add>, %103, %cst_43 [0] : vector<8x32xf32> to vector<32xf32>
    %105 = vector.shape_cast %104 : vector<32xf32> to vector<1x32xf32>
    %cst_44 = arith.constant 8.000000e+00 : f32
    %106 = vector.broadcast %cst_44 : f32 to vector<1x32xf32>
    %107 = arith.divf %105, %106 : vector<1x32xf32>
    %c0_45 = arith.constant 0 : index
    %c0_46 = arith.constant 0 : index
    %108 = vector.load %arg7[%c0_45, %c0_46] : memref<1x32xf32, #tpu.memory_space<vmem>>, vector<1x32xf32>
    %109 = arith.mulf %107, %108 : vector<1x32xf32>
    %cst_47 = arith.constant dense<0.000000e+00> : vector<1xf32>
    %110 = vector.multi_reduction <add>, %109, %cst_47 [1] : vector<1x32xf32> to vector<1xf32>
    %111 = vector.shape_cast %110 : vector<1xf32> to vector<1x1xf32>
    %c0_48 = arith.constant 0 : index
    %c0_49 = arith.constant 0 : index
    %112 = vector.load %arg8[%c0_48, %c0_49] : memref<1x1xf32, #tpu.memory_space<vmem>>, vector<1x1xf32>
    %113 = arith.addf %111, %112 : vector<1x1xf32>
    %c0_50 = arith.constant 0 : index
    %c0_51 = arith.constant 0 : index
    %c0_52 = arith.constant 0 : index
    %114 = vector.load %arg9[%c0_50, %c0_51, %c0_52] : memref<1x1x1xf32, #tpu.memory_space<vmem>>, vector<1x1x1xf32>
    %115 = vector.shape_cast %114 : vector<1x1x1xf32> to vector<1x1xf32>
    %116 = vector.shape_cast %113 : vector<1x1xf32> to vector<1x1x1xf32>
    tpu.vector_store %arg9[%c0_50, %c0_51, %c0_52], %116 {strides = array<i32>} : memref<1x1x1xf32, #tpu.memory_space<vmem>>, vector<1x1x1xf32>,
    return
  }
  func.func @transform_0(%arg0: i32) -> (i32, i32) {
    %c0_i32 = arith.constant 0 : i32
    %c0_i32_0 = arith.constant 0 : i32
    return %arg0, %c0_i32 : i32, i32
  }
  func.func @transform_1(%arg0: i32) -> (i32, i32) {
    %c0_i32 = arith.constant 0 : i32
    %c0_i32_0 = arith.constant 0 : i32
    %c0_i32_1 = arith.constant 0 : i32
    return %c0_i32, %c0_i32_0 : i32, i32
  }
  func.func @transform_2(%arg0: i32) -> (i32, i32) {
    %c0_i32 = arith.constant 0 : i32
    %c0_i32_0 = arith.constant 0 : i32
    %c0_i32_1 = arith.constant 0 : i32
    return %c0_i32, %c0_i32_0 : i32, i32
  }
  func.func @transform_3(%arg0: i32) -> (i32, i32) {
    %c0_i32 = arith.constant 0 : i32
    %c0_i32_0 = arith.constant 0 : i32
    %c0_i32_1 = arith.constant 0 : i32
    return %c0_i32, %c0_i32_0 : i32, i32
  }
  func.func @transform_4(%arg0: i32) -> (i32, i32) {
    %c0_i32 = arith.constant 0 : i32
    %c0_i32_0 = arith.constant 0 : i32
    %c0_i32_1 = arith.constant 0 : i32
    return %c0_i32, %c0_i32_0 : i32, i32
  }
  func.func @transform_5(%arg0: i32) -> (i32, i32) {
    %c0_i32 = arith.constant 0 : i32
    %c0_i32_0 = arith.constant 0 : i32
    %c0_i32_1 = arith.constant 0 : i32
    return %c0_i32, %c0_i32_0 : i32, i32
  }
  func.func @transform_6(%arg0: i32) -> (i32, i32) {
    %c0_i32 = arith.constant 0 : i32
    %c0_i32_0 = arith.constant 0 : i32
    %c0_i32_1 = arith.constant 0 : i32
    return %c0_i32, %c0_i32_0 : i32, i32
  }
  func.func @transform_7(%arg0: i32) -> (i32, i32) {
    %c0_i32 = arith.constant 0 : i32
    %c0_i32_0 = arith.constant 0 : i32
    %c0_i32_1 = arith.constant 0 : i32
    return %c0_i32, %c0_i32_0 : i32, i32
  }
  func.func @transform_8(%arg0: i32) -> (i32, i32, i32) {
    %c0_i32 = arith.constant 0 : i32
    %c0_i32_0 = arith.constant 0 : i32
    %c0_i32_1 = arith.constant 0 : i32
    return %arg0, %c0_i32, %c0_i32_0 : i32, i32, i32
  }
}

</mosaic_0001>

<bundles_post_ra>
// kernel: _forward.2
= control target key start
LH: loop header
LB: loop body
LE: loop exit
PB: predicated region body
PF: predicated region fallthrough
CT: control target
= control target key end

     0   :  { %vm32_vm0 = vcmask 130048   ;;  %v479_v8 = vmov 0   ;;  %vm213_vm1 = vcmask 261120   ;;  %s587_s6 = inlined_call_operand.vmem [shape: f32[16,32], index: 6, kind: input, shape index: {}]   ;;  %s588_s0 = inlined_call_operand.vmem [shape: f32[16,16], index: 0, kind: input, shape index: {}]   ;;  %s589_s3 = inlined_call_operand.vmem [shape: f32[16,16], index: 3, kind: input, shape index: {}]   ;;  %s590_s1 = inlined_call_operand.vmem [shape: f32[16,16], index: 1, kind: input, shape index: {}]   ;;  %s591_s2 = inlined_call_operand.vmem [shape: f32[16,1], index: 2, kind: input, shape index: {}]   ;;  %s592_s5 = inlined_call_operand.vmem [shape: f32[16,1], index: 5, kind: input, shape index: {}]   ;;  %s593_s4 = inlined_call_operand.vmem [shape: f32[16,16], index: 4, kind: input, shape index: {}]   ;;  %s594_s7 = inlined_call_operand.vmem [shape: f32[16,32], index: 7, kind: output, shape index: {0}]   ;;  %s595_s8 = inlined_call_operand.vmem [shape: f32[16,32], index: 8, kind: output, shape index: {1}]  }
   0x1   :  { %v28_v0 = vld [vmem:[%s587_s6] sm:$0xff]  ;;  %v29_v1 = vld [vmem:[%s587_s6 + $0x8] sm:$0xff]  ;;  %477 = vset.pattern.permute.xlu0 %v479_v8  ;;  %478 = vset.pattern.permute.xlu1 %v479_v8 }
   0x2   :  { %v30_v2 = vld [vmem:[%s588_s0] sm:$0xff]  ;;  %v460_v3 = vpack.c.bf16 %v29_v1, %v28_v0  ;;  %v31_v4 = vld [vmem:[%s588_s0 + $0x8] sm:$0xff] }
   0x3   :  { %436 = vmatprep.mubr.msk.f32.mxu0 %vm32_vm0, %v30_v2  ;;  %v216_v5 = vld [vmem:[%s589_s3] sm:$0xff]  ;;  %v217_v6 = vld [vmem:[%s589_s3 + $0x8] sm:$0xff] }
   0x4   :  { %461 = vmatprep.subr.bf16.mxu0 %v460_v3  ;;  %v114_v7 = vld [vmem:[%s590_s1] sm:$0xff]  ;;  %v198_v11 = vld [vmem:[%s591_s2 + $0x8] sm:$0xff] }
   0x5   :  { %463 = vmatpush3.bf16.msra.mxu0 %v460_v3  ;;  %443 = vmatprep.mubr.msk.f32.mxu1 %vm32_vm0, %v114_v7  ;;  %v197_v9 = vld [vmem:[%s591_s2] sm:$0xff]  ;;  %v383_v12 = vld [vmem:[%s592_s5 + $0x8] sm:$0xff] }
   0x6   :  { %469 = vmatprep.subr.bf16.mxu0 %v460_v3  ;;  %v382_v10 = vld [vmem:[%s592_s5] sm:$0xff]  ;;  %201 = vperm.xlu0 %477, %v197_v9   ;;  %v115_v18 = vld [vmem:[%s590_s1 + $0x8] sm:$0xff] }
   0x7   :  { %386 = vperm.xlu1 %478, %v382_v10   ;;  %v299_v20 = vld [vmem:[%s593_s4] sm:$0xff]  ;;  %v300_v21 = vld [vmem:[%s593_s4 + $0x8] sm:$0xff] }
   0x8   :  { %437 = vmatmul.mubr.msk.f32.vlgmr.msra.gmra.mrb[0].mxu0 %vm32_vm0, %v31_v4 }
   0x9   :  { %471 = vmatpush3.bf16.msra.mxu0 %v460_v3  ;;  %450 = vmatprep.mubr.msk.f32.mxu0 %vm32_vm0, %v216_v5 }
   0xa   :  { %206 = vperm.xlu0 %477, %v198_v11  }
   0xb   :  { %391 = vperm.xlu1 %478, %v383_v12  }
   0xc   :  { %451 = vmatmul.mubr.msk.f32.vlgmr.msra.gmra.mrb[2].mxu0 %vm32_vm0, %v217_v6 }
  0x85   :  { %v202_v22 = vpop.permute.xlu0 %201 }
  0x86   :  { %v387_v23 = vpop.permute.xlu1 %386 }
  0x89   :  { %v207_v24 = vpop.permute.xlu0 %206 }
  0x8a   :  { %v392_v31 = vpop.permute.xlu1 %391 }
  0xdb   :  { %v438_v13 = vpop.f32.mrb[0].mxu0 }
  0xdc   :  { %v105_v14 = vpop.f32.mrb[1].mxu0 }
  0xdd   :  { %v464_v15 = vpack.c.bf16 %v438_v13, %v105_v14 }
  0xdf   :  { %465 = vmatprep.subr.bf16.mxu1 %v464_v15  ;;  %v452_v16 = vpop.f32.mrb[2].mxu0 }
  0xe0   :  { %467 = vmatpush3.bf16.msra.mxu1 %v464_v15  ;;  %v290_v17 = vpop.f32.mrb[3].mxu0 }
  0xe1   :  { %v472_v19 = vpack.c.bf16 %v452_v16, %v290_v17 }
  0xe3   :  { %444 = vmatmul.mubr.msk.f32.vlgmr.msra.gmra.mrb[0].mxu1 %vm32_vm0, %v115_v18  ;;  %473 = vmatprep.subr.bf16.mxu1 %v472_v19 }
  0xe4   :  { %475 = vmatpush3.bf16.msra.mxu1 %v472_v19  ;;  %457 = vmatprep.mubr.msk.f32.mxu1 %vm32_vm0, %v299_v20 }
  0xe7   :  { %458 = vmatmul.mubr.msk.f32.vlgmr.msra.gmra.mrb[2].mxu1 %vm32_vm0, %v300_v21 }
 0x1b6   :  { %v445_v25 = vpop.f32.mrb[0].mxu1 }
 0x1b7   :  { %v210_v26 = vmul.f32 %v445_v25, %v207_v24  ;;  %v188_v27 = vpop.f32.mrb[1].mxu1 }
 0x1b8   :  { %v209_v28 = vmul.f32 %v202_v22, %v188_v27 }
 0x1b9   :  { %v212_v29 = vmax.f32 %v210_v26, 0.0 }
 0x1ba   :  { %v211_v30 = vmax.f32 %v209_v28, 0.0  ;;  %v459_v32 = vpop.f32.mrb[2].mxu1 }
 0x1bb   :  { %215 = vst.msk [vmem:[%s594_s7 + $0x8] sm:$0xff] %vm213_vm1, %v212_v29  ;;  %v395_v33 = vmul.f32 %v459_v32, %v392_v31  ;;  %v373_v34 = vpop.f32.mrb[3].mxu1 }
 0x1bc   :  { %214 = vst.msk [vmem:[%s594_s7] sm:$0xff] %vm213_vm1, %v211_v30  ;;  %v394_v35 = vmul.f32 %v387_v23, %v373_v34 }
 0x1bd   :  { %v397_v36 = vmax.f32 %v395_v33, 0.0 }
 0x1be   :  { %v396_v37 = vmax.f32 %v394_v35, 0.0 }
 0x1bf   :  { %399 = vst.msk [vmem:[%s595_s8 + $0x8] sm:$0xff] %vm213_vm1, %v397_v36 }
 0x1c0   :  { %398 = vst.msk [vmem:[%s595_s8] sm:$0xff] %vm213_vm1, %v396_v37 }

// kernel: _forward.3
= control target key start
LH: loop header
LB: loop body
LE: loop exit
PB: predicated region body
PF: predicated region fallthrough
CT: control target
= control target key end

     0   :  { %s2170_s29 = smov 0   ;;  %s2398_s0 = inlined_call_operand.vmem [shape: f32[16,32], index: 0, kind: input, shape index: {}]   ;;  %s2399_s1 = inlined_call_operand.vmem [shape: f32[16,32], index: 1, kind: input, shape index: {}]   ;;  %s2400_s2 = inlined_call_operand.vmem [shape: f32[32,32], index: 2, kind: input, shape index: {}]   ;;  %s2401_s3 = inlined_call_operand.vmem [shape: f32[32,32], index: 3, kind: input, shape index: {}]   ;;  %s2402_s4 = inlined_call_operand.vmem [shape: f32[32,32], index: 4, kind: input, shape index: {}]   ;;  %s2403_s5 = inlined_call_operand.vmem [shape: f32[1,32], index: 5, kind: input, shape index: {}]   ;;  %s2404_s6 = inlined_call_operand.vmem [shape: f32[1,32], index: 6, kind: input, shape index: {}]   ;;  %s2405_s7 = inlined_call_operand.<no memory space> [shape: f32[1,1], index: 7, kind: input, shape index: {}]   ;;  %s2406_s8 = inlined_call_operand.vmem [shape: f32[2,1,1], index: 8, kind: output, shape index: {}]  }
   0x1   :  { %v13_v0 = vstv %s2405_s7 }
   0x2   :  { %14 = vst [vmem:[#allocation2] sm:$0x1] %v13_v0 }
   0x3 LB: > { %s1753_s30 = sadd.s32 4294967295, %s2116_s29   ;;  %p1757_p0 = scmp.ge.s32.totalorder %s2116_s29, 1  ;;  %s2116_s29 = sphi %s2170_s29, %s20_s29  }
   0x4   : > { %p263_p1 = scmp.lt.s32.totalorder %s2116_s29, 3 }
   0x6   : > { %p264_p2 = pnand %p1757_p0, %p263_p1 }
   0x7   : > { %v304_v1 = vld [vmem:[%s2400_s2] sm:$0xff] (!%p264_p2)  ;;  %v305_v2 = vld [vmem:[%s2400_s2 + $0x8] sm:$0xff] (!%p264_p2)  ;;  %v306_v3 = vld [vmem:[%s2400_s2 + $0x10] sm:$0xff] (!%p264_p2)  ;;  %v2118_v4 = vmov (!%p264_p2), 0.0|0.0   ;;  %vm2119_vm0 = vmmov (!%p264_p2), 0   ;;  %v2120_v7 = vmov (!%p264_p2), 0.0  }
   0x8   : > { %267 = sbr.rel (%p264_p2) target bundleno = 3018 (0xbca), region = 52  ;;  %2000 = vmatprep.subr.bf16.mxu0 (!%p264_p2), %v2118_v4  ;;  %v2188_v5 = vpack.c.bf16 (!%p264_p2), %v305_v2, %v304_v1  ;;  %v307_v6 = vld [vmem:[%s2400_s2 + $0x18] sm:$0xff] (!%p264_p2)  ;;  %1865 = vmatprep.mubr.msk.f32.mxu0 (!%p264_p2), %vm2119_vm0, %v2120_v7  ;;  %p294_p3 = scmp.lt.s32.totalorder (!%p264_p2), %s1753_s30, 1  ;;  %vm317_vm1 = vcmask (!%p264_p2), 261120   ;;  %v2198_v8 = vld [vmem:[%s2399_s1] sm:$0xff] (!%p264_p2)  ;;  %v2203_v9 = vld [vmem:[%s2399_s1 + $0x8] sm:$0xff] (!%p264_p2) }
   0x9   : > { %2006 = vmatprep.subr.bf16.mxu1 (!%p264_p2), %v2118_v4  ;;  %v2007_v10 = vpack.c.bf16 (!%p264_p2), %v2203_v9, %v2198_v8  ;;  %vm2210_vm2 = vmpackc.low (!%p264_p2), %vm317_vm1, %vm317_vm1  ;;  %1872 = vmatprep.mubr.msk.f32.mxu1 (!%p264_p2), %vm2119_vm0, %v2120_v7  ;;  %v2217_v12 = vpack.c.bf16 (!%p264_p2), %v307_v6, %v306_v3  ;;  %vm741_vm3 = vcmask (!%p264_p2), 130112   ;;  %vm626_vm4 = vcmask (!%p264_p2), 64512   ;;  %s2121_s24 = smov (!%p264_p2), 120   ;;  %v312_v46 = vld [vmem:[%s2402_s4] sm:$0xff] (!%p264_p2)  ;;  %v313_v47 = vld [vmem:[%s2402_s4 + $0x8] sm:$0xff] (!%p264_p2) }
   0xa   : > { %2002 = vmatpush3.bf16.msra.mxu0 (!%p264_p2), %v2188_v5  ;;  %v2273_v48 = vpack.c.bf16 (!%p264_p2), %v313_v47, %v312_v46  ;;  %v314_v55 = vld [vmem:[%s2402_s4 + $0x10] sm:$0xff] (!%p264_p2)  ;;  %v315_v56 = vld [vmem:[%s2402_s4 + $0x18] sm:$0xff] (!%p264_p2)  ;;  %v308_v58 = vld [vmem:[%s2401_s3] sm:$0xff] (!%p264_p2)  ;;  %vm1698_vm5 = vcmask (!%p264_p2), 253952   ;;  %vm1704_vm6 = vcmask (!%p264_p2), 0  }
   0xb   : > { %2003 = vmatprep.subr.bf16.mxu0 (!%p264_p2), %v2118_v4  ;;  %2009 = vmatpush3.bf16.xpose.msk.msra.mxu1 (!%p264_p2), %vm2210_vm2, %v2007_v10  ;;  %v2290_v57 = vpack.c.bf16 (!%p264_p2), %v315_v56, %v314_v55  ;;  %v309_v59 = vld [vmem:[%s2401_s3 + $0x8] sm:$0xff] (!%p264_p2)  ;;  %v310_v2 = vld [vmem:[%s2401_s3 + $0x10] sm:$0xff] (!%p264_p2)  ;;  %v311_v3 = vld [vmem:[%s2401_s3 + $0x18] sm:$0xff] (!%p264_p2) }
   0xc   : > { %v2302_v60 = vpack.c.bf16 (!%p264_p2), %v309_v59, %v308_v58  ;;  %v2319_v6 = vpack.c.bf16 (!%p264_p2), %v311_v3, %v310_v2  ;;  %v1696_v3 = vld [vmem:[%s2404_s6] sm:$0x1] (!%p264_p2) }
   0xe   : > { %2005 = vmatpush3.bf16.msra.mxu0 (!%p264_p2), %v2217_v12 }
   0xf   : > { %s2410_s30 = smov (!%p294_p3, %s1753_s30), 1  ;;  %2011 = vmatprep.subr.bf16.mxu0 %v2188_v5 }
  0x10   : > { %s1758_s20 = sshll.u32 %s2410_s30, 3  ;;  %s300_s26 = scalar_lea.vmem %s2406_s8, %s2410_s30 }
  0x11   : > { %s297_s23 = scalar_lea.vmem %s2398_s0, %s1758_s20 }
  0x12   : > { %v2229_v13 = vld [vmem:[%s297_s23] sm:$0xff] }
  0x13   : > { %1886 = vmatprep.subr.msk.mxu1 %vm317_vm1, %v2229_v13  ;;  %1866 = vmatmul.mubr.msk.f32.vlgmr.msra.gmra.mrb[0].mxu0 %vm317_vm1, %v2229_v13 }
  0x14   : > { %2013 = vmatpush3.bf16.msra.mxu0 %v2188_v5  ;;  %1883 = vmatprep.mubr.msk.f32.mxu0 %vm317_vm1, %v2198_v8 }
  0x15   : > { %2015 = vmatprep.subr.bf16.mxu0 %v2217_v12 }
  0x18   : > { %2017 = vmatpush3.bf16.msra.mxu0 %v2217_v12 }
  0x19   : > { %1896 = vmatprep.subr.mxu0 %v2120_v7 }
  0x1b   : > { %1884 = vmatmul.mubr.msk.f32.vlgmr.msra.gmra.mrb[2].mxu0 %vm317_vm1, %v2203_v9 }
  0x1c   : > { %1897 = vmatpush3.msra.mxu0 %v2203_v9  ;;  %1898 = vmatprep.mubr.msk.f32.mxu0 %vm2119_vm0, %v2120_v7 }
  0x1d   : > { %1901 = vmatprep.subr.mxu0 %v2120_v7 }
  0xe6   : > { %v387_v14 = vpop.f32.mrb[0].mxu0 }
  0xe7   : > { %v1867_v15 = vpop.f32.mrb[1].mxu0  ;;  %1873 = vmatmul.mubr.msk.f32.vlgmr.msra.gmra.mrb[0].mxu1 %vm317_vm1, %v387_v14 }
  0xe8   : > { %1887 = vmatpush3.xpose.msk.msra.mxu1 %vm317_vm1, %v2229_v13 }
  0xe9   : > { %1891 = vmatprep.subr.mxu1 %v2229_v13 }
  0xee   : > { %v1885_v16 = vpop.f32.mrb[2].mxu0 }
  0xef   : > { %v536_v17 = vpop.f32.mrb[3].mxu0 }
  0xf0   : > { %1888 = vmatprep.mubr.msk.f32.mxu1 %vm317_vm1, %v536_v17 }
  0xf1   : > { %1889 = vmatmul.mubr.msk.f32.vlgmr.msra.gmra.mrb[2].mxu1 %vm317_vm1, %v1885_v16 }
  0xf2   : > { %1892 = vmatpush3.msra.mxu1 %v2229_v13 }
  0xf3   : > { %2019 = vmatprep.subr.bf16.mxu1 %v2273_v48 }
 0x1ba   : > { %v466_v18 = vpop.f32.mrb[0].mxu1 }
 0x1bb   : > { %v1874_v19 = vpop.f32.mrb[1].mxu1  ;;  %v742_v20 = vsel %vm741_vm3, %v466_v18, -inf  ;;  %v730_v21 = vsel %vm626_vm4, %v466_v18, -inf }
 0x1bc   : > { %743 = vmax.xlane.f32.xlu0 %v742_v20  ;;  %731 = vmax.xlane.f32.xlu1 %v730_v21 }
 0x1c4   : > { %v2257_v22 = vpop.f32.mrb[2].mxu1 }
 0x1c5   : > { %v617_v23 = vpop.f32.mrb[3].mxu1  ;;  %v630_v44 = vsel %vm626_vm4, %v2257_v22, -inf }
 0x1c6   : > { %v627_v28 = vsel %vm626_vm4, %v617_v23, -inf }
 0x249   : > { %v744_v24 = vpop.xlane.xlu0 %743  ;;  %v732_v29 = vpop.xlane.xlu1 %731 }
 0x24a   : > { %v745_v25 = vsub.f32 %v466_v18, %v744_v24  ;;  %v733_v30 = vsub.f32 %v466_v18, %v732_v29 }
 0x24c   : > { %v746_v26 = vmul.f32 1.442695, %v745_v25  ;;  %v734_v31 = vmul.f32 1.442695, %v733_v30 }
 0x24e   : > { %2086 = vpow2.f32 %v746_v26 }
 0x24f   : > { %2088 = vpow2.f32 %v734_v31 }
 0x258   : > { %v2087_v27 = vpop.eup %2086 }
 0x259   : > { %749 = vrot.lane.b32.xlu0 %v2087_v27, %s2121_s24  ;;  %v2089_v34 = vpop.eup %2088 }
 0x25a   : > { %v736_v35 = vsel %vm626_vm4, %v2089_v34, 0.0 }
 0x278   : > { %628 = vmax.xlane.f32.xlu0 %v627_v28 }
 0x2cb   : > { %v750_v32 = vpop.permute.xlu0 %749 }
 0x2cc   : > { %v752_v33 = vsel %vm626_vm4, %v750_v32, 0.0 }
 0x2cd   : > { %753 = vadd.xlane.f32.xlu1 %v752_v33 }
 0x2d1   : > { %737 = vadd.xlane.f32.xlu1 %v736_v35 }
 0x305   : > { %v629_v36 = vpop.xlane.xlu0 %628 }
 0x306   : > { %v633_v37 = vsub.f32 %v617_v23, %v629_v36 }
 0x308   : > { %v635_v38 = vmul.f32 1.442695, %v633_v37 }
 0x30a   : > { %2090 = vpow2.f32 %v635_v38 }
 0x314   : > { %v2091_v39 = vpop.eup %2090 }
 0x315   : > { %v639_v40 = vsel %vm626_vm4, %v2091_v39, 0.0 }
 0x316   : > { %640 = vadd.xlane.f32.xlu0 %v639_v40 }
 0x35a   : > { %v754_v41 = vpop.xlane.xlu1 %753 }
 0x35b   : > { %2092 = vrcp.f32 %v754_v41 }
 0x35e   : > { %v738_v51 = vpop.xlane.xlu1 %737 }
 0x365   : > { %v2093_v42 = vpop.eup %2092 }
 0x366   : > { %v756_v43 = vmul.f32 %v2093_v42, %v2087_v27 }
 0x368   : > { %758 = vrot.lane.b32.xlu1 %v756_v43, %s2121_s24 }
 0x38c   : > { %631 = vmax.xlane.f32.xlu1 %v630_v44 }
 0x3a3   : > { %v641_v45 = vpop.xlane.xlu0 %640 }
 0x3a4   : > { %2094 = vrcp.f32 %v641_v45 }
 0x3a5   : > { %2096 = vrcp.f32 %v738_v51 }
 0x3ae   : > { %v2095_v49 = vpop.eup %2094 }
 0x3af   : > { %v647_v50 = vmul.f32 %v2095_v49, %v2091_v39  ;;  %v2097_v53 = vpop.eup %2096 }
 0x3b0   : > { %v740_v54 = vmul.f32 %v2097_v53, %v2089_v34 }
 0x3b1   : > { %1893 = vmatprep.mubr.msk.f32.mxu1 %vm626_vm4, %v647_v50 }
 0x3da   : > { %v759_v52 = vpop.permute.xlu1 %758 }
 0x3db   : > { %1899 = vmatmul.mubr.msk.f32.vlgmr.msra.gmra.mrb[4].mxu0 %vm626_vm4, %v759_v52 }
 0x3dc   : > { %1902 = vmatpush3.msra.mxu0 %v2198_v8  ;;  %1903 = vmatprep.mubr.msk.f32.mxu0 %vm2119_vm0, %v2120_v7 }
 0x3dd   : > { %2034 = vmatprep.subr.bf16.mxu0 %v2118_v4 }
 0x3e3   : > { %1904 = vmatmul.mubr.msk.f32.vlgmr.msra.gmra.mrb[4].mxu0 %vm626_vm4, %v740_v54 }
 0x3e4   : > { %2036 = vmatpush3.bf16.msra.mxu0 %v2273_v48  ;;  %1936 = vmatprep.mubr.msk.f32.mxu0 %vm2119_vm0, %v2120_v7 }
 0x3e5   : > { %2037 = vmatprep.subr.bf16.mxu0 %v2118_v4 }
 0x3e8   : > { %2039 = vmatpush3.bf16.msra.mxu0 %v2290_v57 }
 0x3e9   : > { %2040 = vmatprep.subr.bf16.mxu0 %v2118_v4 }
 0x3eb   : > { %1937 = vmatmul.mubr.msk.f32.vlgmr.msra.gmra.mrb[6].mxu0 %vm317_vm1, %v2229_v13 }
 0x3ec   : > { %2042 = vmatpush3.bf16.msra.mxu0 %v2302_v60  ;;  %1947 = vmatprep.mubr.msk.f32.mxu0 %vm2119_vm0, %v2120_v7 }
 0x3ed   : > { %2043 = vmatprep.subr.bf16.mxu0 %v2118_v4 }
 0x3f0   : > { %2045 = vmatpush3.bf16.msra.mxu0 %v2319_v6 }
 0x3f1   : > { %2052 = vmatprep.subr.bf16.mxu0 %v2118_v4 }
 0x419   : > { %v632_v61 = vpop.xlane.xlu1 %631 }
 0x41a   : > { %v634_v62 = vsub.f32 %v2257_v22, %v632_v61 }
 0x41c   : > { %v637_v63 = vmul.f32 1.442695, %v634_v62 }
 0x41e   : > { %2098 = vpow2.f32 %v637_v63 }
 0x428   : > { %v2099_v0 = vpop.eup %2098 }
 0x429   : > { %v642_v1 = vsel %vm626_vm4, %v2099_v0, 0.0 }
 0x42a   : > { %643 = vadd.xlane.f32.xlu0 %v642_v1 }
 0x4b6   : > { %v901_v10 = vpop.f32.mrb[4].mxu0 }
 0x4b7   : > { %v1069_v13 = vmul.f32 0.5, %v901_v10  ;;  %v1905_v14 = vpop.f32.mrb[5].mxu0  ;;  %v644_v15 = vpop.xlane.xlu0 %643 }
 0x4b8   : > { %2100 = vrcp.f32 %v644_v15  ;;  %v1702_v14 = vld [vmem:[#allocation2] sm:$0x1] }
 0x4b9   : > { %v1070_v16 = vmax.f32 %v1069_v13, 0.0 }
 0x4bb   : > { %1948 = vmatmul.mubr.msk.f32.vlgmr.msra.gmra.mrb[8].mxu0 %vm317_vm1, %v1070_v16 }
 0x4bc   : > { %1965 = vmatprep.mubr.msk.f32.mxu0 %vm2119_vm0, %v2120_v7 }
 0x4be   : > { %v1137_v17 = vpop.f32.mrb[6].mxu0 }
 0x4bf   : > { %v1938_v18 = vpop.f32.mrb[7].mxu0 }
 0x4c2   : > { %v2101_v19 = vpop.eup %2100 }
 0x4c3   : > { %v648_v20 = vmul.f32 %v2101_v19, %v2099_v0 }
 0x4c5   : > { %1894 = vmatmul.mubr.msk.f32.vlgmr.msra.gmra.mrb[4].mxu1 %vm626_vm4, %v648_v20 }
 0x4c6   : > { %2021 = vmatpush3.bf16.msra.mxu1 %v2273_v48  ;;  %1914 = vmatprep.mubr.msk.f32.mxu1 %vm317_vm1, %v2198_v8 }
 0x4c7   : > { %2023 = vmatprep.subr.bf16.mxu1 %v2290_v57 }
 0x4ca   : > { %2025 = vmatpush3.bf16.msra.mxu1 %v2290_v57 }
 0x4cb   : > { %2027 = vmatprep.subr.bf16.mxu1 %v2302_v60 }
 0x4cd   : > { %1915 = vmatmul.mubr.msk.f32.vlgmr.msra.gmra.mrb[6].mxu1 %vm317_vm1, %v2203_v9  ;;  %v2348_v9 = vld [vmem:[%s2403_s5] ss:$0 sm:$0xff] }
 0x4ce   : > { %2029 = vmatpush3.bf16.msra.mxu1 %v2302_v60 }
 0x4cf   : > { %2031 = vmatprep.subr.bf16.mxu1 %v2319_v6 }
 0x4d2   : > { %2033 = vmatpush3.bf16.msra.mxu1 %v2319_v6 }
 0x4d3   : > { %2046 = vmatprep.subr.bf16.mxu1 %v2118_v4 }
 0x58e   : > { %v1210_v21 = vpop.f32.mrb[8].mxu0 }
 0x58f   : > { %v1211_v22 = vadd.f32 %v1210_v21, %v1137_v17  ;;  %v1949_v8 = vpop.f32.mrb[9].mxu0 }
 0x591   : > { %v1214_v25 = vadd.f32 %v2348_v9, %v1211_v22 }
 0x598   : > { %v1895_v23 = vpop.f32.mrb[4].mxu1 }
 0x599   : > { %v721_v24 = vpop.f32.mrb[5].mxu1 }
 0x59a   : > { %1925 = vmatprep.mubr.msk.f32.mxu1 %vm317_vm1, %v721_v24 }
 0x59b   : > { %1926 = vmatmul.mubr.msk.f32.vlgmr.msra.gmra.mrb[6].mxu1 %vm317_vm1, %v1895_v23 }
 0x59c   : > { %2048 = vmatpush3.bf16.msra.mxu1 %v2188_v5  ;;  %1958 = vmatprep.mubr.msk.f32.mxu1 %vm2119_vm0, %v2120_v7 }
 0x59d   : > { %2049 = vmatprep.subr.bf16.mxu1 %v2118_v4 }
 0x5a0   : > { %2051 = vmatpush3.bf16.msra.mxu1 %v2217_v12 }
 0x5a1   : > { %1968 = vmatprep.subr.mxu1 %v2120_v7 }
 0x5a3   : > { %1959 = vmatmul.mubr.msk.f32.vlgmr.msra.gmra.mrb[8].mxu1 %vm317_vm1, %v1214_v25 }
 0x5a4   : > { %1970 = vmatprep.mubr.msk.f32.mxu1 %vm2119_vm0, %v2120_v7 }
 0x66e   : > { %v1927_v5 = vpop.f32.mrb[6].mxu1 }
 0x66f   : > { %v1068_v26 = vadd.f32 %v1927_v5, %v2348_v9  ;;  %v1052_v27 = vpop.f32.mrb[7].mxu1 }
 0x670   : > { %v1067_v28 = vadd.f32 %v2348_v9, %v1052_v27 }
 0x671   : > { %1969 = vmatpush3.msra.mxu1 %v1068_v26 }
 0x672   : > { %v2053_v29 = vpack.c.bf16 %v1068_v26, %v1067_v28  ;;  %1973 = vmatprep.subr.mxu1 %v2120_v7 }
 0x674   : > { %2055 = vmatpush3.bf16.xpose.msk.msra.mxu0 %vm2210_vm2, %v2053_v29 }
 0x675   : > { %2056 = vmatprep.subr.bf16.mxu0 %v2118_v4 }
 0x676   : > { %v1284_v12 = vpop.f32.mrb[8].mxu1 }
 0x677   : > { %v1960_v30 = vpop.f32.mrb[9].mxu1 }
 0x67b   : > { %1966 = vmatmul.mubr.msk.f32.vlgmr.msra.gmra.mrb[10].mxu0 %vm317_vm1, %v1284_v12 }
 0x67c   : > { %2058 = vmatpush3.bf16.msra.mxu0 %v2273_v48  ;;  %1986 = vmatprep.mubr.msk.f32.mxu0 %vm2119_vm0, %v2120_v7 }
 0x67d   : > { %2059 = vmatprep.subr.bf16.mxu0 %v2118_v4 }
 0x680   : > { %2061 = vmatpush3.bf16.msra.mxu0 %v2290_v57 }
 0x683   : > { %1987 = vmatmul.mubr.msk.f32.vlgmr.msra.gmra.mrb[12].mxu0 %vm317_vm1, %v1214_v25 }
 0x74e   : > { %v1363_v31 = vpop.f32.mrb[10].mxu0 }
 0x74f   : > { %v1967_v11 = vpop.f32.mrb[11].mxu0  ;;  %v1378_v32 = vsel %vm741_vm3, %v1363_v31, -inf  ;;  %v1367_v33 = vsel %vm626_vm4, %v1363_v31, -inf }
 0x750   : > { %1379 = vmax.xlane.f32.xlu0 %v1378_v32 }
 0x754   : > { %1368 = vmax.xlane.f32.xlu0 %v1367_v33 }
 0x756   : > { %v1609_v34 = vpop.f32.mrb[12].mxu0 }
 0x757   : > { %v1988_v35 = vpop.f32.mrb[13].mxu0 }
 0x7dd   : > { %v1380_v36 = vpop.xlane.xlu0 %1379 }
 0x7de   : > { %v1381_v37 = vsub.f32 %v1363_v31, %v1380_v36 }
 0x7e0   : > { %v1382_v38 = vmul.f32 1.442695, %v1381_v37 }
 0x7e1   : > { %v1369_v40 = vpop.xlane.xlu0 %1368 }
 0x7e2   : > { %2102 = vpow2.f32 %v1382_v38  ;;  %v1370_v41 = vsub.f32 %v1363_v31, %v1369_v40 }
 0x7e4   : > { %v1371_v42 = vmul.f32 1.442695, %v1370_v41 }
 0x7e6   : > { %2104 = vpow2.f32 %v1371_v42 }
 0x7ec   : > { %v2103_v39 = vpop.eup %2102 }
 0x7ed   : > { %1385 = vrot.lane.b32.xlu1 %v2103_v39, %s2121_s24 }
 0x7f0   : > { %v2105_v45 = vpop.eup %2104 }
 0x7f1   : > { %v1373_v46 = vsel %vm626_vm4, %v2105_v45, 0.0 }
 0x85f   : > { %v1386_v43 = vpop.permute.xlu1 %1385 }
 0x860   : > { %v1388_v44 = vsel %vm626_vm4, %v1386_v43, 0.0 }
 0x861   : > { %1389 = vadd.xlane.f32.xlu0 %v1388_v44 }
 0x865   : > { %1374 = vadd.xlane.f32.xlu0 %v1373_v46 }
 0x8ee   : > { %v1390_v47 = vpop.xlane.xlu0 %1389 }
 0x8ef   : > { %2106 = vrcp.f32 %v1390_v47 }
 0x8f2   : > { %v1375_v50 = vpop.xlane.xlu0 %1374 }
 0x8f3   : > { %2108 = vrcp.f32 %v1375_v50 }
 0x8f9   : > { %v2107_v48 = vpop.eup %2106 }
 0x8fa   : > { %v1392_v49 = vmul.f32 %v2107_v48, %v2103_v39 }
 0x8fc   : > { %1394 = vrot.lane.b32.xlu0 %v1392_v49, %s2121_s24 }
 0x8fd   : > { %v2109_v52 = vpop.eup %2108 }
 0x8fe   : > { %v1377_v53 = vmul.f32 %v2109_v52, %v2105_v45 }
 0x96e   : > { %v1395_v51 = vpop.permute.xlu0 %1394 }
 0x96f   : > { %1971 = vmatmul.mubr.msk.f32.vlgmr.msra.gmra.mrb[10].mxu1 %vm626_vm4, %v1395_v51 }
 0x970   : > { %1974 = vmatpush3.msra.mxu1 %v1067_v28  ;;  %1975 = vmatprep.mubr.msk.f32.mxu1 %vm2119_vm0, %v2120_v7 }
 0x971   : > { %2062 = vmatprep.subr.bf16.mxu1 %v2118_v4 }
 0x977   : > { %1976 = vmatmul.mubr.msk.f32.vlgmr.msra.gmra.mrb[10].mxu1 %vm626_vm4, %v1377_v53 }
 0x978   : > { %2064 = vmatpush3.bf16.msra.mxu1 %v2302_v60  ;;  %1997 = vmatprep.mubr.msk.f32.mxu1 %vm2119_vm0, %v2120_v7 }
 0x979   : > { %2065 = vmatprep.subr.bf16.mxu1 %v2118_v4 }
 0x97c   : > { %2067 = vmatpush3.bf16.msra.mxu1 %v2319_v6 }
 0xa4a   : > { %v1537_v54 = vpop.f32.mrb[10].mxu1 }
 0xa4b   : > { %v1541_v55 = vmul.f32 0.5, %v1537_v54  ;;  %v1977_v56 = vpop.f32.mrb[11].mxu1 }
 0xa4d   : > { %v1542_v57 = vmax.f32 %v1541_v55, 0.0 }
 0xa4f   : > { %1998 = vmatmul.mubr.msk.f32.vlgmr.msra.gmra.mrb[12].mxu1 %vm317_vm1, %v1542_v57 }
 0xb22   : > { %v1682_v58 = vpop.f32.mrb[12].mxu1 }
 0xb23   : > { %v1683_v59 = vadd.f32 %v1682_v58, %v1609_v34  ;;  %v1999_v61 = vpop.f32.mrb[13].mxu1 }
 0xb25   : > { %v1686_v62 = vadd.f32 %v2348_v9, %v1683_v59 }
 0xb27   : > { %v1687_v60 = vsel %vm317_vm1, %v1686_v62, 0.0 }
 0xb28   : > { %v1688_v63 = vrot.slane %v1687_v60, 4 }
 0xb2a   : > { %v1689_v7 = vadd.f32 %v1688_v63, %v1687_v60 }
 0xb2c   : > { %v1690_v0 = vrot.slane %v1689_v7, 2 }
 0xb2e   : > { %v1691_v4 = vadd.f32 %v1690_v0, %v1689_v7 }
 0xb30   : > { %v1692_v1 = vrot.slane %v1691_v4, 1 }
 0xb32   : > { %v1693_v2 = vadd.f32 %v1692_v1, %v1691_v4 }
 0xb34   : > { %v1695_v6 = vmul.f32 0.125, %v1693_v2 }
 0xb36   : > { %v1697_v10 = vmul.f32 %v1696_v3, %v1695_v6 }
 0xb38   : > { %v1699_v13 = vsel %vm1698_vm5, %v1697_v10, 0.0 }
 0xb39   : > { %1700 = vadd.xlane.f32.xlu1 %v1699_v13 }
 0xbc6   : > { %v1701_v15 = vpop.xlane.xlu1 %1700 }
 0xbc7   : > { %v1703_v16 = vadd.f32 %v1702_v14, %v1701_v15 }
 0xbc9   : > { %1705 = vst.msk [vmem:[%s300_s26] sm:$0x1] %vm1704_vm6, %v1703_v16 }
 0xbca PF: > { %s20_s29 = sadd.s32 1, %s2116_s29  }
 0xbcb   : > { %p17_p4 = scmp.ge.s32.totalorder %s20_s29, 4  }
 0xbcd   :  { %19 = sbr.rel (!%p17_p4) target bundleno = 3 (0x3), region = 82 }

</bundles_post_ra>
